<compile_context>
chip_gen: v5e
topology: v5e:2x2
jax: 0.10.0
libtpu: 0.0.40
codegen_flags: <defaults>
</compile_context>

<pallas_src>
import jax
import jax.numpy as jnp
from jax import lax
from jax.experimental import pallas as pl
from jax.experimental.pallas import tpu as pltpu


LN_EPS = 1e-5          # PyTorch nn.LayerNorm default eps


def _round_up(x, m):
    return ((x + m - 1) // m) * m


# ---------------------------------------------------------------------------
# Fused Pallas kernel:
#   FFN(y) -> residual add -> LayerNorm(norm3, affine folded) -> quantile proj
# ---------------------------------------------------------------------------
def _make_fused_head_kernel(compute_dtype):
    def kernel(y_ref, w1_ref, b1_ref, w2_ref, b2_ref, wp_ref, bp_ref, o_ref):
        # y_ref:  [tm, D]    post-norm2 activations of the last decoder layer
        # w1_ref: [D, d_ff]  pre-transposed FFN weight 1;  b1_ref: [1, d_ff]
        # w2_ref: [d_ff, D]  pre-transposed FFN weight 2;  b2_ref: [1, D]
        # wp_ref: [D, n_out] LN-affine-folded projection weight
        # bp_ref: [1, n_out] LN-affine-folded projection bias
        # o_ref:  [tm, n_out] compact output (no lane padding, no XLA slice after)
        cd = compute_dtype
        y = y_ref[...].astype(jnp.float32)

        # Feed-forward entirely in VMEM: the [tm, d_ff] hidden never hits HBM.
        h1 = jnp.dot(y.astype(cd), w1_ref[...].astype(cd),
                     preferred_element_type=jnp.float32) + b1_ref[...]
        h1 = jnp.maximum(h1, 0.0)                                   # ReLU
        f = jnp.dot(h1.astype(cd), w2_ref[...].astype(cd),
                    preferred_element_type=jnp.float32) + b2_ref[...]

        # Residual + LayerNorm (norm3).  Affine is folded into wp/bp.
        h = y + f
        mu = jnp.mean(h, axis=-1, keepdims=True)
        var = jnp.mean(jnp.square(h - mu), axis=-1, keepdims=True)
        n = (h - mu) * lax.rsqrt(var + LN_EPS)

        # Quantile projection (LN scale/shift already baked into wp/bp).
        acc = jnp.dot(n.astype(cd), wp_ref[...].astype(cd),
                      preferred_element_type=jnp.float32)
        o_ref[...] = (acc + bp_ref[...]).astype(o_ref.dtype)
    return kernel


def prepare_fused_head_params(ff_params, ln3_params, proj_params):
    """One-time prep of the fused-head operands (no per-call transpose/fold).

    Returns pre-transposed FFN weights and the projection weight/bias with the
    norm3 LayerNorm affine folded in:
        W' = gamma[:, None] * W_proj.T            [D, n_out]
        b' = beta @ W_proj.T + b_proj             [1, n_out]
    so the kernel only needs the normalized (zero-mean/unit-var) activations.
    """
    w1_t = ff_params["l1"]["w"].T.astype(jnp.float32)               # [D, d_ff]
    b1 = ff_params["l1"]["b"].reshape(1, -1).astype(jnp.float32)    # [1, d_ff]
    w2_t = ff_params["l2"]["w"].T.astype(jnp.float32)               # [d_ff, D]
    b2 = ff_params["l2"]["b"].reshape(1, -1).astype(jnp.float32)    # [1, D]
    g = ln3_params["g"].astype(jnp.float32)                         # [D]
    be = ln3_params["b"].astype(jnp.float32)                        # [D]
    w_proj_t = proj_params["w"].T.astype(jnp.float32)               # [D, n_out]
    wp = g[:, None] * w_proj_t                                      # fold LN scale
    bp = (be @ w_proj_t + proj_params["b"].astype(jnp.float32)
          ).reshape(1, -1)                                          # fold LN shift
    return {"w1_t": w1_t, "b1": b1, "w2_t": w2_t, "b2": b2, "wp": wp, "bp": bp}


def fused_decoder_head(y, head, *, tm=None, compute_dtype=jnp.float32,
                       out_dtype=jnp.float32):
    """Fused last-decoder-layer FFN + residual + norm3 + quantile projection.

    Args:
      y: [B, S, D] post-norm2 activations of the last decoder layer.
      head: dict from prepare_fused_head_params.
    Returns:
      [M, n_out] compact output (M = B*S); caller reshapes to
      (B, S, output_dim, num_quantiles).
    """
    B, S, D = y.shape
    M = B * S
    d_ff = head["w1_t"].shape[1]
    n_out = head["wp"].shape[1]
    y2 = y.reshape(M, D).astype(jnp.float32)

    # ---- row-tile selection ------------------------------------------------
    if tm is None:
        tm = 1024                     # measured: >=1024 rows ~ HBM roofline
    tm = min(tm, M)
    if M > 8:
        # Guarantee >= 2 grid blocks so both v7x TensorCores get work and the
        # DMA pipeline has something to double-buffer.
        tm = min(tm, _round_up(pl.cdiv(M, 2), 8))
    if tm != M and tm % 8 != 0:
        # Round DOWN to a multiple of 8; never silently fall back to tm = M.
        tm = max((tm // 8) * 8, 8) if M >= 8 else M
        tm = min(tm, M)
    grid_m = pl.cdiv(M, tm)

    # ---- explicit VMEM budget (weights resident + double-buffered tiles) ----
    vmem_est = 4 * (2 * tm * (D + d_ff + n_out)          # y / hidden / out tiles
                    + 2 * (D * d_ff + d_ff * D + D * n_out)  # resident weights
                    + 4 * (d_ff + D + n_out))             # biases + headroom
    vmem_limit = int(min(64 << 20, max(3 * vmem_est, 8 << 20)))

    cost = pl.CostEstimate(
        flops=(2 * M * D * d_ff            # y @ W1ᵀ
               + 2 * M * d_ff * D          # h1 @ W2ᵀ
               + 2 * M * D * n_out         # projection
               + 10 * M * D + 2 * M * d_ff),  # residual/LN/ReLU elementwise
        transcendentals=M,                 # one rsqrt per row
        bytes_accessed=4 * (M * D + M * n_out
                            + 2 * D * d_ff + D * n_out
                            + d_ff + D + n_out),
    )

    out = pl.pallas_call(
        _make_fused_head_kernel(compute_dtype),
        out_shape=jax.ShapeDtypeStruct((M, n_out), out_dtype),
        grid=(grid_m,),
        in_specs=[
            pl.BlockSpec((tm, D), lambda i: (i, 0)),        # y tile
            pl.BlockSpec((D, d_ff), lambda i: (0, 0)),      # W1ᵀ (resident)
            pl.BlockSpec((1, d_ff), lambda i: (0, 0)),      # b1
            pl.BlockSpec((d_ff, D), lambda i: (0, 0)),      # W2ᵀ (resident)
            pl.BlockSpec((1, D), lambda i: (0, 0)),         # b2
            pl.BlockSpec((D, n_out), lambda i: (0, 0)),     # folded proj weight
            pl.BlockSpec((1, n_out), lambda i: (0, 0)),     # folded proj bias
        ],
        out_specs=pl.BlockSpec((tm, n_out), lambda i: (i, 0)),
        compiler_params=pltpu.CompilerParams(
            dimension_semantics=("parallel",),
            vmem_limit_bytes=vmem_limit),
        cost_estimate=cost,
    )(y2, head["w1_t"], head["b1"], head["w2_t"], head["b2"],
      head["wp"], head["bp"])
    return out


# ---------------------------------------------------------------------------
# Plain-JAX building blocks (kept in XLA: overhead-bound at these sizes)
# ---------------------------------------------------------------------------
def _linear(x, p):
    return jnp.matmul(x, p["w"].T, precision="highest") + p["b"]


def _layer_norm(x, g, b, eps=LN_EPS):
    mu = jnp.mean(x, axis=-1, keepdims=True)
    var = jnp.mean(jnp.square(x - mu), axis=-1, keepdims=True)
    return (x - mu) / jnp.sqrt(var + eps) * g + b


def _mha(q_in, k_in, v_in, p, num_heads, mask=None):
    B, Sq, D = q_in.shape
    hd = D // num_heads
    q = _linear(q_in, p["q"]).reshape(B, Sq, num_heads, hd).transpose(0, 2, 1, 3)
    k = _linear(k_in, p["k"]).reshape(B, -1, num_heads, hd).transpose(0, 2, 1, 3)
    v = _linear(v_in, p["v"]).reshape(B, -1, num_heads, hd).transpose(0, 2, 1, 3)
    scores = jnp.einsum("bhqd,bhkd->bhqk", q, k,
                        precision="highest") / jnp.sqrt(jnp.float32(hd))
    if mask is not None:
        scores = jnp.where(mask == 0, -1e9, scores)
    w = jax.nn.softmax(scores, axis=-1)
    attn = jnp.einsum("bhqk,bhkd->bhqd", w, v,
                      precision="highest").transpose(0, 2, 1, 3).reshape(B, Sq, D)
    return _linear(attn, p["o"])


def _ffn(x, p):
    return _linear(jax.nn.relu(_linear(x, p["l1"])), p["l2"])


# ---------------------------------------------------------------------------
# Full MultiHorizonTransformer forward (inference: dropout = identity)
# ---------------------------------------------------------------------------
def multi_horizon_transformer_forward(params, src, tgt, *, num_heads,
                                      output_dim, num_quantiles,
                                      use_pallas=True, tm=None):
    B, S_src, _ = src.shape
    S_tgt = tgt.shape[1]

    # create_masks
    src_mask = jnp.ones((B, 1, 1, S_src), jnp.float32)
    tgt_mask = jnp.tril(jnp.ones((S_tgt, S_tgt), jnp.float32))[None, None, :, :]

    # TODO(synk): nn.Dropout layers are identity at inference; training-mode
    # dropout is intentionally not implemented.

    # ---- encode ----
    x = _linear(src, params["emb"]) + params["pos"][:, :S_src, :]
    for lp in params["enc"]:
        a = _mha(x, x, x, lp["attn"], num_heads, src_mask)
        x = _layer_norm(x + a, lp["ln1"]["g"], lp["ln1"]["b"])
        f = _ffn(x, lp["ff"])
        x = _layer_norm(x + f, lp["ln2"]["g"], lp["ln2"]["b"])
    memory = x

    # ---- decode ----
    y = _linear(tgt, params["emb"]) + params["pos"][:, :S_tgt, :]
    n_dec = len(params["dec"])
    for li, lp in enumerate(params["dec"]):
        sa = _mha(y, y, y, lp["self_attn"], num_heads, tgt_mask)
        y = _layer_norm(y + sa, lp["ln1"]["g"], lp["ln1"]["b"])
        ca = _mha(y, memory, memory, lp["cross_attn"], num_heads, src_mask)
        y = _layer_norm(y + ca, lp["ln2"]["g"], lp["ln2"]["b"])
        if li == n_dec - 1 and use_pallas:
            # Fused Pallas kernel: FFN + residual + norm3 + quantile projection,
            # compact [M, n_out] output (no slicing / reshuffling afterwards).
            out2 = fused_decoder_head(y, params["fused_head"], tm=tm)
            return out2.reshape(B, S_tgt, output_dim, num_quantiles)
        f = _ffn(y, lp["ff"])
        y = _layer_norm(y + f, lp["ln3"]["g"], lp["ln3"]["b"])

    # pure-JAX reference path (use_pallas=False) — the loop above finished with
    # the standard FFN/norm3 for the last layer too.
    out = _linear(y, params["proj"])
    return out.reshape(B, S_tgt, output_dim, num_quantiles)


# ---------------------------------------------------------------------------
# Deterministic synthetic parameters (PyTorch nn.Linear / nn.LayerNorm layouts)
# ---------------------------------------------------------------------------
def _init_linear(key, out_dim, in_dim, w_scale=0.05, b_scale=0.01):
    kw, kb = jax.random.split(key)
    return {"w": jax.random.normal(kw, (out_dim, in_dim), jnp.float32) * w_scale,
            "b": jax.random.normal(kb, (out_dim,), jnp.float32) * b_scale}


def _init_ln(key, dim):
    kg, kb = jax.random.split(key)
    return {"g": 1.0 + 0.1 * jax.random.normal(kg, (dim,), jnp.float32),
            "b": 0.1 * jax.random.normal(kb, (dim,), jnp.float32)}


def _init_attn(key, d_model):
    ks = jax.random.split(key, 4)
    return {"q": _init_linear(ks[0], d_model, d_model),
            "k": _init_linear(ks[1], d_model, d_model),
            "v": _init_linear(ks[2], d_model, d_model),
            "o": _init_linear(ks[3], d_model, d_model)}


def _init_ffn(key, d_model, d_ff):
    k1, k2 = jax.random.split(key)
    return {"l1": _init_linear(k1, d_ff, d_model),
            "l2": _init_linear(k2, d_model, d_ff)}


def init_params(key, *, input_dim, output_dim, d_model, num_heads,
                num_encoder_layers, num_decoder_layers, d_ff,
                num_quantiles, max_len=64):
    del num_heads  # shapes don't depend on it
    keys = jax.random.split(key, 4 + num_encoder_layers + num_decoder_layers)
    params = {
        "emb": _init_linear(keys[0], d_model, input_dim),
        "pos": 0.02 * jax.random.normal(keys[1], (1, max_len, d_model), jnp.float32),
    }
    enc = []
    for i in range(num_encoder_layers):
        ka, kf, k1, k2 = jax.random.split(keys[2 + i], 4)
        enc.append({"attn": _init_attn(ka, d_model),
                    "ff": _init_ffn(kf, d_model, d_ff),
                    "ln1": _init_ln(k1, d_model), "ln2": _init_ln(k2, d_model)})
    dec = []
    for i in range(num_decoder_layers):
        ks_, kc, kf, k1, k2, k3 = jax.random.split(keys[2 + num_encoder_layers + i], 6)
        dec.append({"self_attn": _init_attn(ks_, d_model),
                    "cross_attn": _init_attn(kc, d_model),
                    "ff": _init_ffn(kf, d_model, d_ff),
                    "ln1": _init_ln(k1, d_model), "ln2": _init_ln(k2, d_model),
                    "ln3": _init_ln(k3, d_model)})
    params["enc"] = enc
    params["dec"] = dec
    n_out = output_dim * num_quantiles
    params["proj"] = _init_linear(
        keys[2 + num_encoder_layers + num_decoder_layers], n_out, d_model)
    # One-time prep of the fused-head operands (pre-transposed FFN weights,
    # LN-affine-folded projection weight/bias).
    params["fused_head"] = prepare_fused_head_params(
        dec[-1]["ff"], dec[-1]["ln3"], params["proj"])
    return params


if __name__ == "__main__":
    # Small config consistent with the module (scaled down from 256/8/6/6/1024).
    input_dim = 6
    output_dim = 4
    quantiles = [0.1, 0.5, 0.9]
    num_quantiles = len(quantiles)
    d_model = 32
    num_heads = 4
    num_encoder_layers = 2
    num_decoder_layers = 2
    d_ff = 64
    B, S_src, S_tgt = 2, 8, 8

    key = jax.random.PRNGKey(0)
    kp, ks, kt = jax.random.split(key, 3)
    params = init_params(kp, input_dim=input_dim, output_dim=output_dim,
                         d_model=d_model, num_heads=num_heads,
                         num_encoder_layers=num_encoder_layers,
                         num_decoder_layers=num_decoder_layers,
                         d_ff=d_ff, num_quantiles=num_quantiles)
    src = jax.random.normal(ks, (B, S_src, input_dim), jnp.float32)
    tgt = jax.random.normal(kt, (B, S_tgt, input_dim), jnp.float32)

    # Pallas path. Default tm logic makes the M=16 rows split into 2 grid
    # blocks (tm=8), exercising the "parallel" multi-block path.
    out = multi_horizon_transformer_forward(
        params, src, tgt, num_heads=num_heads, output_dim=output_dim,
        num_quantiles=num_quantiles, use_pallas=True)
    out = jax.block_until_ready(out)

    # Pure-JAX reference of the full forward pass.
    ref = multi_horizon_transformer_forward(
        params, src, tgt, num_heads=num_heads, output_dim=output_dim,
        num_quantiles=num_quantiles, use_pallas=False)
    ref = jax.block_until_ready(ref)

    assert out.shape == (B, S_tgt, output_dim, num_quantiles), out.shape
    max_err = float(jnp.max(jnp.abs(out - ref)))
    assert jnp.allclose(out, ref, atol=1e-3, rtol=1e-3), max_err

    print("KERNEL_OK")
</pallas_src>

<mosaic_0001>
module attributes {stable_mosaic.version = 11 : i64} {
  func.func @kernel(%arg0: i32, %arg1: memref<8x32xf32, #tpu.memory_space<vmem>>, %arg2: memref<32x64xf32, #tpu.memory_space<vmem>>, %arg3: memref<1x64xf32, #tpu.memory_space<vmem>>, %arg4: memref<64x32xf32, #tpu.memory_space<vmem>>, %arg5: memref<1x32xf32, #tpu.memory_space<vmem>>, %arg6: memref<32x12xf32, #tpu.memory_space<vmem>>, %arg7: memref<1x12xf32, #tpu.memory_space<vmem>>, %arg8: memref<8x12xf32, #tpu.memory_space<vmem>>) attributes {dimension_semantics = [#tpu.dimension_semantics<parallel>], iteration_bounds = array<i64: 2>, scalar_prefetch = 0 : i64, scratch_operands = 0 : i64, tpu.core_type = #tpu.core_type<tc>, window_params = [{transform_indices = @transform_0, window_bounds = array<i64: 8, 32>}, {pipeline_mode = #tpu.pipeline_mode<synchronous>, transform_indices = @transform_1, window_bounds = array<i64: 32, 64>}, {pipeline_mode = #tpu.pipeline_mode<synchronous>, transform_indices = @transform_2, window_bounds = array<i64: 1, 64>}, {pipeline_mode = #tpu.pipeline_mode<synchronous>, transform_indices = @transform_3, window_bounds = array<i64: 64, 32>}, {pipeline_mode = #tpu.pipeline_mode<synchronous>, transform_indices = @transform_4, window_bounds = array<i64: 1, 32>}, {pipeline_mode = #tpu.pipeline_mode<synchronous>, transform_indices = @transform_5, window_bounds = array<i64: 32, 12>}, {pipeline_mode = #tpu.pipeline_mode<synchronous>, transform_indices = @transform_6, window_bounds = array<i64: 1, 12>}, {transform_indices = @transform_7, window_bounds = array<i64: 8, 12>}]} {
    %c0 = arith.constant 0 : index
    %c0_0 = arith.constant 0 : index
    %0 = vector.load %arg1[%c0, %c0_0] : memref<8x32xf32, #tpu.memory_space<vmem>>, vector<8x32xf32>
    %c0_1 = arith.constant 0 : index
    %c0_2 = arith.constant 0 : index
    %1 = vector.load %arg2[%c0_1, %c0_2] : memref<32x64xf32, #tpu.memory_space<vmem>>, vector<32x64xf32>
    %cst = arith.constant dense<0.000000e+00> : vector<8x64xf32>
    %2 = tpu.matmul %0, %1, %cst {dimension_numbers = #tpu.dot_dimension_numbers<[1], [0], [0], [1], [0, 0, 1, 1], [], []>} : vector<8x32xf32>, vector<32x64xf32>, vector<8x64xf32> -> vector<8x64xf32>
    %c0_3 = arith.constant 0 : index
    %c0_4 = arith.constant 0 : index
    %3 = vector.load %arg3[%c0_3, %c0_4] : memref<1x64xf32, #tpu.memory_space<vmem>>, vector<1x64xf32>
    %4 = vector.broadcast %3 : vector<1x64xf32> to vector<8x64xf32>
    %5 = arith.addf %2, %4 : vector<8x64xf32>
    %cst_5 = arith.constant 0.000000e+00 : f32
    %6 = vector.broadcast %cst_5 : f32 to vector<8x64xf32>
    %7 = arith.maximumf %5, %6 : vector<8x64xf32>
    %c0_6 = arith.constant 0 : index
    %c0_7 = arith.constant 0 : index
    %8 = vector.load %arg4[%c0_6, %c0_7] : memref<64x32xf32, #tpu.memory_space<vmem>>, vector<64x32xf32>
    %cst_8 = arith.constant dense<0.000000e+00> : vector<8x32xf32>
    %9 = tpu.matmul %7, %8, %cst_8 {dimension_numbers = #tpu.dot_dimension_numbers<[1], [0], [0], [1], [0, 0, 1, 1], [], []>} : vector<8x64xf32>, vector<64x32xf32>, vector<8x32xf32> -> vector<8x32xf32>
    %c0_9 = arith.constant 0 : index
    %c0_10 = arith.constant 0 : index
    %10 = vector.load %arg5[%c0_9, %c0_10] : memref<1x32xf32, #tpu.memory_space<vmem>>, vector<1x32xf32>
    %11 = vector.broadcast %10 : vector<1x32xf32> to vector<8x32xf32>
    %12 = arith.addf %9, %11 : vector<8x32xf32>
    %13 = arith.addf %0, %12 : vector<8x32xf32>
    %cst_11 = arith.constant dense<0.000000e+00> : vector<8xf32>
    %14 = vector.multi_reduction <add>, %13, %cst_11 [1] : vector<8x32xf32> to vector<8xf32>
    %15 = vector.shape_cast %14 : vector<8xf32> to vector<8x1xf32>
    %cst_12 = arith.constant 3.200000e+01 : f32
    %16 = vector.broadcast %cst_12 : f32 to vector<8x1xf32>
    %17 = arith.divf %15, %16 : vector<8x1xf32>
    %18 = vector.broadcast %17 : vector<8x1xf32> to vector<8x32xf32>
    %19 = arith.subf %13, %18 : vector<8x32xf32>
    %20 = arith.mulf %19, %19 : vector<8x32xf32>
    %cst_13 = arith.constant dense<0.000000e+00> : vector<8xf32>
    %21 = vector.multi_reduction <add>, %20, %cst_13 [1] : vector<8x32xf32> to vector<8xf32>
    %22 = vector.shape_cast %21 : vector<8xf32> to vector<8x1xf32>
    %cst_14 = arith.constant 3.200000e+01 : f32
    %23 = vector.broadcast %cst_14 : f32 to vector<8x1xf32>
    %24 = arith.divf %22, %23 : vector<8x1xf32>
    %25 = vector.broadcast %17 : vector<8x1xf32> to vector<8x32xf32>
    %26 = arith.subf %13, %25 : vector<8x32xf32>
    %cst_15 = arith.constant 9.99999974E-6 : f32
    %27 = vector.broadcast %cst_15 : f32 to vector<8x1xf32>
    %28 = arith.addf %24, %27 : vector<8x1xf32>
    %29 = math.rsqrt %28 : vector<8x1xf32>
    %30 = vector.broadcast %29 : vector<8x1xf32> to vector<8x32xf32>
    %31 = arith.mulf %26, %30 : vector<8x32xf32>
    %c0_16 = arith.constant 0 : index
    %c0_17 = arith.constant 0 : index
    %32 = vector.load %arg6[%c0_16, %c0_17] : memref<32x12xf32, #tpu.memory_space<vmem>>, vector<32x12xf32>
    %cst_18 = arith.constant dense<0.000000e+00> : vector<8x12xf32>
    %33 = tpu.matmul %31, %32, %cst_18 {dimension_numbers = #tpu.dot_dimension_numbers<[1], [0], [0], [1], [0, 0, 1, 1], [], []>} : vector<8x32xf32>, vector<32x12xf32>, vector<8x12xf32> -> vector<8x12xf32>
    %c0_19 = arith.constant 0 : index
    %c0_20 = arith.constant 0 : index
    %34 = vector.load %arg7[%c0_19, %c0_20] : memref<1x12xf32, #tpu.memory_space<vmem>>, vector<1x12xf32>
    %35 = vector.broadcast %34 : vector<1x12xf32> to vector<8x12xf32>
    %36 = arith.addf %33, %35 : vector<8x12xf32>
    %c0_21 = arith.constant 0 : index
    %c0_22 = arith.constant 0 : index
    %37 = vector.load %arg8[%c0_21, %c0_22] : memref<8x12xf32, #tpu.memory_space<vmem>>, vector<8x12xf32>
    tpu.vector_store %arg8[%c0_21, %c0_22], %36 {strides = array<i32>} : memref<8x12xf32, #tpu.memory_space<vmem>>, vector<8x12xf32>,
    return
  }
  func.func @transform_0(%arg0: i32) -> (i32, i32) {
    %c0_i32 = arith.constant 0 : i32
    %c0_i32_0 = arith.constant 0 : i32
    return %arg0, %c0_i32 : i32, i32
  }
  func.func @transform_1(%arg0: i32) -> (i32, i32) {
    %c0_i32 = arith.constant 0 : i32
    %c0_i32_0 = arith.constant 0 : i32
    %c0_i32_1 = arith.constant 0 : i32
    return %c0_i32, %c0_i32_0 : i32, i32
  }
  func.func @transform_2(%arg0: i32) -> (i32, i32) {
    %c0_i32 = arith.constant 0 : i32
    %c0_i32_0 = arith.constant 0 : i32
    %c0_i32_1 = arith.constant 0 : i32
    return %c0_i32, %c0_i32_0 : i32, i32
  }
  func.func @transform_3(%arg0: i32) -> (i32, i32) {
    %c0_i32 = arith.constant 0 : i32
    %c0_i32_0 = arith.constant 0 : i32
    %c0_i32_1 = arith.constant 0 : i32
    return %c0_i32, %c0_i32_0 : i32, i32
  }
  func.func @transform_4(%arg0: i32) -> (i32, i32) {
    %c0_i32 = arith.constant 0 : i32
    %c0_i32_0 = arith.constant 0 : i32
    %c0_i32_1 = arith.constant 0 : i32
    return %c0_i32, %c0_i32_0 : i32, i32
  }
  func.func @transform_5(%arg0: i32) -> (i32, i32) {
    %c0_i32 = arith.constant 0 : i32
    %c0_i32_0 = arith.constant 0 : i32
    %c0_i32_1 = arith.constant 0 : i32
    return %c0_i32, %c0_i32_0 : i32, i32
  }
  func.func @transform_6(%arg0: i32) -> (i32, i32) {
    %c0_i32 = arith.constant 0 : i32
    %c0_i32_0 = arith.constant 0 : i32
    %c0_i32_1 = arith.constant 0 : i32
    return %c0_i32, %c0_i32_0 : i32, i32
  }
  func.func @transform_7(%arg0: i32) -> (i32, i32) {
    %c0_i32 = arith.constant 0 : i32
    %c0_i32_0 = arith.constant 0 : i32
    return %arg0, %c0_i32 : i32, i32
  }
}

</mosaic_0001>

<bundles_post_ra>
// kernel: tpu_custom_call.1
= control target key start
LH: loop header
LB: loop body
LE: loop exit
PB: predicated region body
PF: predicated region fallthrough
CT: control target
= control target key end

     0   :  { %12 = vsyncpa [#allocation3], 0  ;;  %s793_s0 = inlined_call_operand.vmem [shape: f32[16,32], index: 0, kind: input, shape index: {}]   ;;  %s794_s1 = inlined_call_operand.vmem [shape: f32[32,64], index: 1, kind: input, shape index: {}]   ;;  %s795_s2 = inlined_call_operand.vmem [shape: f32[1,64], index: 2, kind: input, shape index: {}]   ;;  %s796_s3 = inlined_call_operand.vmem [shape: f32[64,32], index: 3, kind: input, shape index: {}]   ;;  %s797_s4 = inlined_call_operand.vmem [shape: f32[1,32], index: 4, kind: input, shape index: {}]   ;;  %s798_s5 = inlined_call_operand.vmem [shape: f32[32,12], index: 5, kind: input, shape index: {}]   ;;  %s799_s6 = inlined_call_operand.vmem [shape: f32[1,12], index: 6, kind: input, shape index: {}]   ;;  %s800_s7 = inlined_call_operand.hbm [shape: f32[16,12], index: 7, kind: output, shape index: {}]  }
   0x1   :  { %14 = vsyncpa [#allocation3 + $0x1], 0  ;;  %s647_s24 = smov 0   ;;  %s649_s25 = smov 0  }
   0x2   :  { %s651_s26 = smov 0   ;;  %s653_s27 = smov 0  }
   0x3 LB: > { %s668_s28 = sadd.s32 4294967295, %s604_s27   ;;  %s482_s29 = sadd.s32 4294967294, %s604_s27   ;;  %s604_s27 = sphi %s653_s27, %s806_s27   ;;  %s600_s26 = sphi %s651_s26, %s805_s26   ;;  %s596_s25 = sphi %s649_s25, %s804_s25   ;;  %s592_s24 = sphi %s647_s24, %s803_s24  }
   0x4   : > { %s672_s30 = sadd.s32 1, %s604_s27   ;;  %s179_s8 = sadd.s32 1, %s600_s26 }
   0x5   : > { %s176_s9 = ssub.s32 %s604_s27, %s672_s30  ;;  %p189_p0 = scmp.ne.s32.totalorder %s600_s26, %s596_s25 }
   0x6   : > { %p177_p1 = scmp.eq.s32.totalorder %s176_s9, 0  ;;  %p190_p2 = scmp.eq.s32.totalorder %s668_s28, 1 }
   0x7   : > { %p195_p3 = scmp.ne.s32.totalorder %s596_s25, %s592_s24  ;;  %p196_p4 = scmp.eq.s32.totalorder %s482_s29, 1 }
   0x8   : > { %s683_s10 = scalar_select %p177_p1, %s600_s26, %s179_s8  }
   0x9   : > { %p685_p5 = por %p190_p2, %p189_p0  ;;  %p689_p6 = por %p196_p4, %p195_p3 }
   0xa   : > { %p485_p7 = scmp.ge.s32.totalorder %s604_s27, 1  ;;  %p239_p8 = scmp.lt.s32.totalorder %s604_s27, 3 }
   0xc   : > { %p240_p9 = pnand %p485_p7, %p239_p8 }
   0xd   : > { %p270_p10 = scmp.lt.s32.totalorder (!%p240_p9), %s668_s28, 1  ;;  %s267_s9 = sand.u32 (!%p240_p9), 1, %s596_s25  }
   0xe   : > { %243 = sbr.rel (%p240_p9) target bundleno = 688 (0x2b0), region = 48  ;;  %s486_s13 = sshll.u32 (!%p240_p9), %s267_s9, 3 }
   0xf   : > { %s269_s20 = scalar_lea.vmem (!%p240_p9), [#allocation2], %s486_s13  ;;  %s562_s13 = scalar_lea.hbm (!%p240_p9), %s800_s7, 16 }
  0x10   : > { %s420_s21 = sshll.u32 (!%p240_p9), %s269_s20, 4  ;;  %s421_s21 = int_to_ptr.vmem [resolvable:$true] %s420_s21 }
  0x13   : > { %v278_v0 = vld [vmem:[%s794_s1 + $0x18] sm:$0xff]  ;;  %v277_v1 = vld [vmem:[%s794_s1 + $0x10] sm:$0xff]  ;;  %v276_v4 = vld [vmem:[%s794_s1 + $0x8] sm:$0xff]  ;;  %s271_s23 = scalar_select %p270_p10, %s668_s28, 1  ;;  %vm283_vm0 = vcmask 261120   ;;  %vm320_vm1 = vcmask 523264  }
  0x14   : > { %299 = vmatpush.msra.mxu0 %v278_v0  ;;  %v315_v2 = vld [vmem:[%s796_s3 + $0x38] sm:$0xff]  ;;  %v314_v3 = vld [vmem:[%s796_s3 + $0x30] sm:$0xff]  ;;  %v313_v5 = vld [vmem:[%s796_s3 + $0x28] sm:$0xff]  ;;  %v606_v22 = vmov 32.0   ;;  %vm405_vm6 = vcmask 97280  }
  0x15   : > { %332 = vmatpush.msra.mxu1 %v315_v2  ;;  %v275_v6 = vld [vmem:[%s794_s1] sm:$0xff]  ;;  %s487_s14 = sshll.u32 %s271_s23, 3  ;;  %v311_v9 = vld [vmem:[%s796_s3 + $0x18] sm:$0xff]  ;;  %v310_v10 = vld [vmem:[%s796_s3 + $0x10] sm:$0xff]  ;;  %538 = vrcp.f32 %v606_v22  ;;  %s408_s23 = scalar_lea.sflag [#allocation3], %s267_s9 }
  0x16   : > { %300 = vmatpush.msra.mxu0 %v277_v1  ;;  %s273_s17 = scalar_lea.vmem %s793_s0, %s487_s14  ;;  %v312_v7 = vld [vmem:[%s796_s3 + $0x20] sm:$0xff]  ;;  %v309_v11 = vld [vmem:[%s796_s3 + $0x8] sm:$0xff]  ;;  %v377_v34 = vld [vmem:[%s798_s5 + $0x18] sm:$0xff]  ;;  %s492_s14 = sshll.u32 %s668_s28, 3 }
  0x17   : > { %333 = vmatpush.msra.mxu1 %v314_v3  ;;  %v274_v8 = vld [vmem:[%s273_s17] sm:$0xff]  ;;  %397 = vmatpush.msra.mxu2 %v377_v34  ;;  %v376_v35 = vld [vmem:[%s798_s5 + $0x10] sm:$0xff]  ;;  %v375_v36 = vld [vmem:[%s798_s5 + $0x8] sm:$0xff]  ;;  %s418_s17 = scalar_lea.hbm %s800_s7, %s492_s14 }
  0x18   : > { %301 = vmatpush.msra.mxu0 %v276_v4  ;;  %v308_v12 = vld [vmem:[%s796_s3] sm:$0xff]  ;;  %s422_s22 = sshll.u32 %s418_s17, 4  ;;  %s423_s22 = int_to_ptr.hbm [resolvable:$true] %s422_s22 }
  0x19   : > { %334 = vmatpush.msra.mxu1 %v313_v5  ;;  %v535_v13 = vld [vmem:[%s795_s2] ss:$0 sm:$0xff]  ;;  %398 = vmatpush.msra.mxu2 %v376_v35  ;;  %s556_s28 = sshra.s32 %s423_s22, 4  ;;  %s557_s28 = int_to_ptr.hbm [resolvable:$true] %s556_s28 }
  0x1a   : > { %302 = vmatpush.msra.mxu0 %v275_v6  ;;  %v536_v17 = vld [vmem:[%s797_s4] ss:$0 sm:$0xff]  ;;  %s558_s29 = scalar_lea.hbm %s557_s28, 8  ;;  %p563_p0 = scmp.lt.s32.totalorder %s557_s28, %s800_s7 }
  0x1b   : > { %488 = vmatmul.msk.f32.vlgmr.msra.gmra.mxu0 %vm283_vm0, %v274_v8  ;;  %335 = vmatpush.msra.mxu1 %v312_v7  ;;  %v539_v23 = vpop.eup %538  ;;  %v374_v37 = vld [vmem:[%s798_s5] sm:$0xff]  ;;  %p559_p11 = scmp.ne.s32.totalorder %s557_s28, %s558_s29  ;;  %p564_p1 = scmp.lt.s32.totalorder %s562_s13, %s558_s29 }
  0x1c   : > { %v349_v24 = vmul.f32 32.0, %v539_v23  ;;  %vm353_vm2 = vweird.f32 %v539_v23  ;;  %399 = vmatpush.msra.mxu2 %v375_v36  ;;  %v537_v49 = vld [vmem:[%s799_s6] ss:$0 sm:$0xff] }
  0x1d   : > { %336 = vmatpush.msra.mxu1 %v311_v9  ;;  %p560_p12 = pnand %p559_p11, %p685_p5  ;;  %p565_p2 = por %p564_p1, %p563_p0 }
  0x1e   : > { %v350_v25 = vsub.f32 1.0, %v349_v24  ;;  %400 = vmatpush.msra.mxu2 %v374_v37 }
  0x1f   : > { %337 = vmatpush.msra.mxu1 %v310_v10  ;;  %p561_p13 = pneg %p560_p12 }
  0x20   : > { %v351_v26 = vmul.f32 %v539_v23, %v350_v25 }
  0x21   : > { %338 = vmatpush.msra.mxu1 %v309_v11  ;;  %p566_p3 = pnand %p565_p2, %p561_p13 }
  0x22   : > { %v352_v27 = vadd.f32 %v539_v23, %v351_v26 }
  0x23   : > { %339 = vmatpush.msra.mxu1 %v308_v12 }
  0x24   : > { %v354_v28 = vsel %vm353_vm2, %v539_v23, %v352_v27 }
  0x98   : > { %v304_v14 = vpop.f32.mrf.mxu0 }
  0x99   : > { %v305_v15 = vadd.f32 %v535_v13, %v304_v14 }
  0x9b   : > { %v307_v16 = vmax.f32 %v305_v15, 0.0 }
  0x9d   : > { %489 = vmatmul.msk.f32.vlgmr.msra.gmra.mxu1 %vm320_vm1, %v307_v16 }
 0x11a   : > { %v341_v18 = vpop.f32.mrf.mxu1 }
 0x11b   : > { %v342_v19 = vadd.f32 %v536_v17, %v341_v18 }
 0x11d   : > { %v344_v20 = vadd.f32 %v342_v19, %v274_v8 }
 0x11f   : > { %v345_v21 = vsel %vm283_vm0, %v344_v20, 0.0 }
 0x120   : > { %346 = vadd.xlane.f32.xlu0 %v345_v21 }
 0x193   : > { %v347_v29 = vpop.xlane.xlu0 %346 }
 0x194   : > { %v355_v30 = vmul.f32 %v354_v28, %v347_v29 }
 0x196   : > { %v356_v31 = vsub.f32 %v344_v20, %v355_v30 }
 0x198   : > { %v357_v32 = vmul.f32 %v356_v31, %v356_v31 }
 0x19a   : > { %v358_v33 = vsel %vm283_vm0, %v357_v32, 0.0 }
 0x19b   : > { %359 = vadd.xlane.f32.xlu0 %v358_v33 }
 0x20e   : > { %v360_v38 = vpop.xlane.xlu0 %359 }
 0x20f   : > { %v361_v39 = vmul.f32 %v360_v38, %v354_v28 }
 0x211   : > { %v362_v40 = vadd.f32 1e-05, %v361_v39 }
 0x213   : > { %540 = vrsqrt.f32 %v362_v40  ;;  %vm369_vm4 = vweird.f32 %v362_v40 }
 0x219   : > { %v541_v41 = vpop.eup %540 }
 0x21a   : > { %v364_v42 = vmul.f32 %v541_v41, %v362_v40  ;;  %vm370_vm3 = vweird.f32 %v541_v41 }
 0x21b   : > { %vm371_vm5 = vmor %vm369_vm4, %vm370_vm3 }
 0x21c   : > { %v365_v43 = vmul.f32 %v541_v41, %v364_v42 }
 0x21e   : > { %v366_v44 = vmul.f32 0.5, %v365_v43 }
 0x220   : > { %v367_v45 = vsub.f32 1.5, %v366_v44 }
 0x222   : > { %v368_v46 = vmul.f32 %v541_v41, %v367_v45 }
 0x224   : > { %v372_v47 = vsel %vm371_vm5, %v541_v41, %v368_v46 }
 0x225   : > { %v373_v48 = vmul.f32 %v372_v47, %v356_v31 }
 0x227   : > { %490 = vmatmul.msk.f32.vlgmr.msra.gmra.mxu2 %vm283_vm0, %v373_v48 }
 0x2aa   : > { %v402_v50 = vpop.f32.mrf.mxu2 }
 0x2ab   : > { %v403_v51 = vadd.f32 %v537_v49, %v402_v50 }
 0x2ad   : > { %406 = vst.msk [vmem:[%s269_s20] sm:$0xff] %vm405_vm6, %v403_v51 }
 0x2ae   : > { %569 = shalt.err (!%p566_p3)
}
 0x2af   : > { %495 = dma.vmem_to_hbm [thread:$0]  (%p685_p5), %s421_s21, 128, %s423_s22, %s408_s23  }
 0x2b0 PF: > { %p501_p4 = scmp.ge.s32.totalorder %s604_s27, 2  ;;  %s434_s9 = sand.u32 1, %s592_s24  }
 0x2b1   : > { %s435_s17 = scalar_lea.sflag [#allocation3], %s434_s9 }
 0x2b2   : > { %p498_p7 = pnand %p501_p4, %p689_p6 }
 0x2b4   : > { %p499_p8 = pneg %p498_p7 }
 0x2b6   : > { %587 = dma.done.wait (%p499_p8), %s435_s17, 128  }
 0x2b7   : > { %589 = vsyncadd (%p499_p8), %s435_s17, 4294967168  ;;  %p17_p9 = scmp.ge.s32.totalorder %s672_s30, 4   ;;  %s803_s24 = smov %s596_s25 }
 0x2b8   : > { %s804_s25 = smov %s600_s26  ;;  %s805_s26 = smov %s683_s10 }
 0x2b9   : > { %s806_s27 = smov %s672_s30  ;;  %19 = sbr.rel (!%p17_p9) target bundleno = 3 (0x3), region = 83 }
 0x2be   :  { %441 = vsyncpa [#allocation3], 1 }
 0x2bf   :  { %443 = vsyncpa [#allocation3 + $0x1], 1 }

</bundles_post_ra>
